<compile_context>
chip_gen: v7x
topology: tpu7x:2x2x1
jax: 0.10.0
libtpu: 0.0.40
codegen_flags: <defaults>
</compile_context>

<pallas_src>
import functools

import jax
import jax.numpy as jnp
import numpy as np
from jax import lax
from jax.experimental import pallas as pl
from jax.experimental.pallas import tpu as pltpu

QMIN = 0.0
QMAX = 255.0   # 8-bit affine
LANE = 128


def _round_up(x, m):
    return ((x + m - 1) // m) * m


# ----------------------------- quant-param glue ----------------------------- #
# TODO(synk): the QConfig class itself is not given in the source; a standard
# uint8 affine scheme (scale / zero-point, round+clip, dequant) is substituted
# for activations, weights and bias.

def affine_quant_params(x_min, x_max):
    x_min = x_min.astype(jnp.float32)
    x_max = x_max.astype(jnp.float32)
    scale = (x_max - x_min) / (QMAX - QMIN)
    # Guard degenerate / negative ranges: scale <= 0 would corrupt the clip.
    scale = jnp.where(scale <= 0.0, jnp.float32(1.0), scale)
    zp = jnp.clip(jnp.round(QMIN - x_min / scale), QMIN, QMAX)
    inv_scale = jnp.float32(1.0) / scale
    return scale, inv_scale, zp


def _fake_quant(v, scale, inv_scale, zp):
    # Multiply-by-reciprocal instead of divide; identical formula is used
    # inside the Pallas kernel so the reference matches bit-for-bit.
    q = jnp.clip(jnp.round(v * inv_scale + zp), QMIN, QMAX)
    return (q - zp) * scale


def percentile_max_99_9(x_flat):
    """torch.kthvalue(x, k=round(N*0.999)).values via top_k on the 0.1% tail
    (avoids a full O(N log N) sort over every activation element)."""
    n = x_flat.shape[0]
    k = int(round(n * 99.9 * 0.01))
    k_top = n - k + 1
    vals, _ = lax.top_k(x_flat, k_top)
    return vals[k_top - 1]


def im2col_nhwc(x_nhwc, kh, kw, stride, padding):
    """(N, H, W, C) -> (N*Ho*Wo, KH*KW*C); channel-minor K (lane friendly)."""
    n, h, w, c = x_nhwc.shape
    xp = jnp.pad(x_nhwc, ((0, 0), (padding, padding), (padding, padding), (0, 0)))
    ho = (h + 2 * padding - kh) // stride + 1
    wo = (w + 2 * padding - kw) // stride + 1
    patches = []
    for i in range(kh):
        for j in range(kw):
            patches.append(
                xp[:, i:i + ho * stride:stride, j:j + wo * stride:stride, :])
    col = jnp.stack(patches, axis=3)                 # (N, Ho, Wo, KH*KW, C)
    col = col.reshape(n * ho * wo, kh * kw * c)
    return col, ho, wo


# --------------------------------- kernels ----------------------------------- #

def act_fakequant_kernel(params_ref, x_ref, o_ref):
    # params (SMEM): [inv_scale_a, scale_a, zp_a]
    inv_s = params_ref[0]
    s = params_ref[1]
    zp = params_ref[2]
    q = jnp.clip(jnp.round(x_ref[...] * inv_s + zp), QMIN, QMAX)
    o_ref[...] = ((q - zp) * s).astype(o_ref.dtype)       # bf16 out


def matmul_bias_kernel(x_ref, w_ref, b_ref, o_ref, acc_ref):
    # grid = (M tiles [parallel], K tiles [arbitrary]); acc resident across K.
    @pl.when(pl.program_id(1) == 0)
    def _():
        acc_ref[...] = jnp.zeros_like(acc_ref)

    acc_ref[...] += jnp.dot(x_ref[...], w_ref[...],
                            preferred_element_type=jnp.float32)

    @pl.when(pl.program_id(1) == pl.num_programs(1) - 1)
    def _():
        o_ref[...] = (acc_ref[...] + b_ref[...]).astype(o_ref.dtype)


# -------------------------- pallas-call wrappers ----------------------------- #

def pallas_fake_quant_activations(x, scale_a, inv_scale_a, zp_a):
    """Elementwise fake-quant of the whole activation tensor, pre-im2col."""
    total = x.size
    r = _round_up(total, LANE) // LANE
    tr = min(256, _round_up(r, 8))
    r_pad = _round_up(r, tr)
    flat = jnp.pad(x.reshape(-1).astype(jnp.float32), (0, r_pad * LANE - total))
    x2d = flat.reshape(r_pad, LANE)
    params = jnp.stack([inv_scale_a, scale_a, zp_a]).astype(jnp.float32)
    out = pl.pallas_call(
        act_fakequant_kernel,
        out_shape=jax.ShapeDtypeStruct((r_pad, LANE), jnp.bfloat16),
        grid=(r_pad // tr,),
        in_specs=[
            pl.BlockSpec(memory_space=pltpu.MemorySpace.SMEM),   # quant params
            pl.BlockSpec((tr, LANE), lambda i: (i, 0)),
        ],
        out_specs=pl.BlockSpec((tr, LANE), lambda i: (i, 0)),
        compiler_params=pltpu.CompilerParams(
            dimension_semantics=("parallel",)),
    )(params, x2d)
    return out.reshape(-1)[:total].reshape(x.shape)


def pallas_matmul_bias(xcol, w_mat, b_mat, *, tm=256):
    """(M, Kp) bf16 x (Kp, OCp) bf16 + (1, OCp) f32 -> (M, OCp) f32."""
    m, kp = xcol.shape
    _, ocp = w_mat.shape
    tm = min(tm, _round_up(m, 8))
    m_pad = _round_up(m, tm)
    if m_pad != m:
        xcol = jnp.pad(xcol, ((0, m_pad - m), (0, 0)))
    if kp % 512 == 0:
        tk = 512
    elif kp % 256 == 0:
        tk = 256
    else:
        tk = 128
    grid = (m_pad // tm, kp // tk)
    # VMEM/step (worst case tm=256, tk=512, ocp=128): ~1.3 MiB incl. double
    # buffers — comfortably under the v7x 64 MiB / default scoped limit.
    out = pl.pallas_call(
        matmul_bias_kernel,
        out_shape=jax.ShapeDtypeStruct((m_pad, ocp), jnp.float32),
        grid=grid,
        in_specs=[
            pl.BlockSpec((tm, tk), lambda i, k: (i, k)),     # im2col rows
            pl.BlockSpec((tk, ocp), lambda i, k: (k, 0)),    # weight matrix
            pl.BlockSpec((1, ocp), lambda i, k: (0, 0)),     # bias
        ],
        out_specs=pl.BlockSpec((tm, ocp), lambda i, k: (i, 0)),
        scratch_shapes=[pltpu.VMEM((tm, ocp), jnp.float32)],
        compiler_params=pltpu.CompilerParams(
            dimension_semantics=("parallel", "arbitrary")),
    )(xcol, w_mat, b_mat)
    return out[:m]


# -------------------------------- wrapper ----------------------------------- #

@functools.partial(jax.jit, static_argnames=("stride", "padding"))
def quant_wrapper_conv2d(x_nchw, weight, bias, *, stride=1, padding=1):
    n, c, h, w = x_nchw.shape
    oc, _, kh, kw = weight.shape

    # quantization parameters (wrapper-side scalars)
    a_max = jnp.maximum(percentile_max_99_9(x_nchw.reshape(-1)), 0.0)
    a_min = jnp.zeros_like(a_max)
    scale_a, inv_scale_a, zp_a = affine_quant_params(a_min, a_max)
    scale_w, inv_scale_w, zp_w = affine_quant_params(weight.min(), weight.max())
    scale_b, inv_scale_b, zp_b = affine_quant_params(bias.min(), bias.max())

    # weights / bias: fake-quant ONCE (hoisted out of the grid loop)
    w_q = _fake_quant(weight, scale_w, inv_scale_w, zp_w).astype(jnp.bfloat16)
    b_q = _fake_quant(bias, scale_b, inv_scale_b, zp_b).astype(jnp.float32)

    # activations: fake-quant BEFORE im2col (Pallas elementwise kernel, bf16)
    x_nhwc = x_nchw.transpose(0, 2, 3, 1)
    xq_nhwc = pallas_fake_quant_activations(x_nhwc, scale_a, inv_scale_a, zp_a)

    # im2col on NHWC (channel-minor -> contiguous K)
    xcol, ho, wo = im2col_nhwc(xq_nhwc, kh, kw, stride, padding)   # (M, K) bf16
    m, k = xcol.shape

    # lane-dense padding of K and OC to 128 multiples
    kp = _round_up(k, LANE)
    ocp = _round_up(oc, LANE)
    xcol_p = jnp.pad(xcol, ((0, 0), (0, kp - k)))
    w_mat = w_q.transpose(2, 3, 1, 0).reshape(k, oc)     # (K, OC), (kh,kw,c)-minor
    w_mat = jnp.pad(w_mat, ((0, kp - k), (0, ocp - oc)))
    b_mat = jnp.pad(b_q.reshape(1, oc), ((0, 0), (0, ocp - oc)))

    out = pallas_matmul_bias(xcol_p, w_mat, b_mat)        # (M, OCp) f32
    out = out[:, :oc]

    # back to NCHW (PyTorch output convention)
    y = out.reshape(n, ho, wo, oc).transpose(0, 3, 1, 2)
    return y


# ------------------------------ pure-JAX reference --------------------------- #

def reference_conv2d(x_nchw, weight, bias, *, stride=1, padding=1):
    a_max = jnp.maximum(percentile_max_99_9(x_nchw.reshape(-1)), 0.0)
    a_min = jnp.zeros_like(a_max)
    scale_a, inv_scale_a, zp_a = affine_quant_params(a_min, a_max)
    scale_w, inv_scale_w, zp_w = affine_quant_params(weight.min(), weight.max())
    scale_b, inv_scale_b, zp_b = affine_quant_params(bias.min(), bias.max())

    # Same bf16 rounding of the fake-quantized values as the kernel path.
    x_q = _fake_quant(x_nchw, scale_a, inv_scale_a, zp_a
                      ).astype(jnp.bfloat16).astype(jnp.float32)
    w_q = _fake_quant(weight, scale_w, inv_scale_w, zp_w
                      ).astype(jnp.bfloat16).astype(jnp.float32)
    b_q = _fake_quant(bias, scale_b, inv_scale_b, zp_b)

    y = lax.conv_general_dilated(
        x_q, w_q,
        window_strides=(stride, stride),
        padding=[(padding, padding), (padding, padding)],
        dimension_numbers=("NCHW", "OIHW", "NCHW"),
        preferred_element_type=jnp.float32,
    )
    return y + b_q.reshape(1, -1, 1, 1)


# ---------------------------------- main ------------------------------------ #

if __name__ == "__main__":
    key = jax.random.PRNGKey(0)
    kx, kw_, kb = jax.random.split(key, 3)

    # small Conv2d: in_ch=4, out_ch=8, 3x3, stride 1, padding 1, with bias
    N, C, H, W = 2, 4, 16, 16
    OC, KH, KW = 8, 3, 3

    x = jax.random.normal(kx, (N, C, H, W), dtype=jnp.float32)
    weight = jax.random.normal(kw_, (OC, C, KH, KW), dtype=jnp.float32) * 0.1
    bias = jax.random.normal(kb, (OC,), dtype=jnp.float32) * 0.1

    y = jax.block_until_ready(
        quant_wrapper_conv2d(x, weight, bias, stride=1, padding=1))
    y_ref = jax.block_until_ready(
        reference_conv2d(x, weight, bias, stride=1, padding=1))

    assert y.shape == (N, OC, H, W), y.shape
    np.testing.assert_allclose(np.asarray(y), np.asarray(y_ref),
                               rtol=2e-3, atol=2e-3)
    print("KERNEL_OK")
</pallas_src>

<mosaic_0001>
module attributes {stable_mosaic.version = 11 : i64} {
  func.func @act_fakequant_kernel(%arg0: i32, %arg1: memref<3xf32, #tpu.memory_space<smem>>, %arg2: memref<16x128xf32, #tpu.memory_space<vmem>>, %arg3: memref<16x128xbf16, #tpu.memory_space<vmem>>) attributes {dimension_semantics = [#tpu.dimension_semantics<parallel>], iteration_bounds = array<i64: 1>, scalar_prefetch = 0 : i64, scratch_operands = 0 : i64, tpu.core_type = #tpu.core_type<tc>, window_params = [{transform_indices = @transform_0, window_bounds = array<i64: 3>}, {transform_indices = @transform_1, window_bounds = array<i64: 16, 128>}, {transform_indices = @transform_2, window_bounds = array<i64: 16, 128>}]} {
    %c0 = arith.constant 0 : index
    %0 = memref.load %arg1[%c0] : memref<3xf32, #tpu.memory_space<smem>>
    %c1 = arith.constant 1 : index
    %1 = memref.load %arg1[%c1] : memref<3xf32, #tpu.memory_space<smem>>
    %c2 = arith.constant 2 : index
    %2 = memref.load %arg1[%c2] : memref<3xf32, #tpu.memory_space<smem>>
    %c0_0 = arith.constant 0 : index
    %c0_1 = arith.constant 0 : index
    %3 = vector.load %arg2[%c0_0, %c0_1] : memref<16x128xf32, #tpu.memory_space<vmem>>, vector<16x128xf32>
    %4 = vector.broadcast %0 : f32 to vector<16x128xf32>
    %5 = arith.mulf %3, %4 : vector<16x128xf32>
    %6 = vector.broadcast %2 : f32 to vector<16x128xf32>
    %7 = arith.addf %5, %6 : vector<16x128xf32>
    %8 = math.roundeven %7 : vector<16x128xf32>
    %cst = arith.constant 0.000000e+00 : f32
    %cst_2 = arith.constant 2.550000e+02 : f32
    %9 = vector.broadcast %cst : f32 to vector<16x128xf32>
    %10 = arith.maximumf %9, %8 : vector<16x128xf32>
    %11 = vector.broadcast %cst_2 : f32 to vector<16x128xf32>
    %12 = arith.minimumf %11, %10 : vector<16x128xf32>
    %13 = vector.broadcast %2 : f32 to vector<16x128xf32>
    %14 = arith.subf %12, %13 : vector<16x128xf32>
    %15 = vector.broadcast %1 : f32 to vector<16x128xf32>
    %16 = arith.mulf %14, %15 : vector<16x128xf32>
    %17 = arith.truncf %16 : vector<16x128xf32> to vector<16x128xbf16>
    %c0_3 = arith.constant 0 : index
    %c0_4 = arith.constant 0 : index
    %18 = vector.load %arg3[%c0_3, %c0_4] : memref<16x128xbf16, #tpu.memory_space<vmem>>, vector<16x128xbf16>
    tpu.vector_store %arg3[%c0_3, %c0_4], %17 {strides = array<i32>} : memref<16x128xbf16, #tpu.memory_space<vmem>>, vector<16x128xbf16>,
    return
  }
  func.func @transform_0(%arg0: i32) -> i32 {
    %c0_i32 = arith.constant 0 : i32
    %c0_i32_0 = arith.constant 0 : i32
    return %c0_i32 : i32
  }
  func.func @transform_1(%arg0: i32) -> (i32, i32) {
    %c0_i32 = arith.constant 0 : i32
    %c0_i32_0 = arith.constant 0 : i32
    return %arg0, %c0_i32 : i32, i32
  }
  func.func @transform_2(%arg0: i32) -> (i32, i32) {
    %c0_i32 = arith.constant 0 : i32
    %c0_i32_0 = arith.constant 0 : i32
    return %arg0, %c0_i32 : i32, i32
  }
}

module attributes {stable_mosaic.version = 11 : i64} {
  func.func @matmul_bias_kernel(%arg0: i32, %arg1: i32, %arg2: memref<256x128xbf16, #tpu.memory_space<vmem>>, %arg3: memref<128x128xbf16, #tpu.memory_space<vmem>>, %arg4: memref<1x128xf32, #tpu.memory_space<vmem>>, %arg5: memref<256x128xf32, #tpu.memory_space<vmem>>, %arg6: memref<256x128xf32, #tpu.memory_space<vmem>>) attributes {dimension_semantics = [#tpu.dimension_semantics<parallel>, #tpu.dimension_semantics<arbitrary>], iteration_bounds = array<i64: 2, 1>, scalar_prefetch = 0 : i64, scratch_operands = 1 : i64, tpu.core_type = #tpu.core_type<tc>, window_params = [{transform_indices = @transform_0, window_bounds = array<i64: 256, 128>}, {transform_indices = @transform_1, window_bounds = array<i64: 128, 128>}, {pipeline_mode = #tpu.pipeline_mode<synchronous>, transform_indices = @transform_2, window_bounds = array<i64: 1, 128>}, {transform_indices = @transform_3, window_bounds = array<i64: 256, 128>}]} {
    %c0_i32 = arith.constant 0 : i32
    %0 = arith.cmpi eq, %arg1, %c0_i32 : i32
    %1 = arith.extui %0 : i1 to i32
    %c0_i32_0 = arith.constant 0 : i32
    %2 = arith.cmpi ne, %1, %c0_i32_0 : i32
    scf.if %2 {
      %cst_10 = arith.constant 0.000000e+00 : f32
      %12 = vector.broadcast %cst_10 : f32 to vector<256x128xf32>
      %c0_11 = arith.constant 0 : index
      %c0_12 = arith.constant 0 : index
      %13 = vector.load %arg6[%c0_11, %c0_12] : memref<256x128xf32, #tpu.memory_space<vmem>>, vector<256x128xf32>
      tpu.vector_store %arg6[%c0_11, %c0_12], %12 {strides = array<i32>} : memref<256x128xf32, #tpu.memory_space<vmem>>, vector<256x128xf32>,
    } else {
    }
    %c0 = arith.constant 0 : index
    %c0_1 = arith.constant 0 : index
    %3 = vector.load %arg6[%c0, %c0_1] : memref<256x128xf32, #tpu.memory_space<vmem>>, vector<256x128xf32>
    %c0_2 = arith.constant 0 : index
    %c0_3 = arith.constant 0 : index
    %4 = vector.load %arg2[%c0_2, %c0_3] : memref<256x128xbf16, #tpu.memory_space<vmem>>, vector<256x128xbf16>
    %c0_4 = arith.constant 0 : index
    %c0_5 = arith.constant 0 : index
    %5 = vector.load %arg3[%c0_4, %c0_5] : memref<128x128xbf16, #tpu.memory_space<vmem>>, vector<128x128xbf16>
    %cst = arith.constant dense<0.000000e+00> : vector<256x128xf32>
    %6 = tpu.matmul %4, %5, %cst {dimension_numbers = #tpu.dot_dimension_numbers<[1], [0], [0], [1], [0, 0, 1, 1], [], []>} : vector<256x128xbf16>, vector<128x128xbf16>, vector<256x128xf32> -> vector<256x128xf32>
    %7 = arith.addf %3, %6 : vector<256x128xf32>
    %c0_6 = arith.constant 0 : index
    %c0_7 = arith.constant 0 : index
    %8 = vector.load %arg6[%c0_6, %c0_7] : memref<256x128xf32, #tpu.memory_space<vmem>>, vector<256x128xf32>
    tpu.vector_store %arg6[%c0_6, %c0_7], %7 {strides = array<i32>} : memref<256x128xf32, #tpu.memory_space<vmem>>, vector<256x128xf32>,
    %c0_i32_8 = arith.constant 0 : i32
    %9 = arith.cmpi eq, %arg1, %c0_i32_8 : i32
    %10 = arith.extui %9 : i1 to i32
    %c0_i32_9 = arith.constant 0 : i32
    %11 = arith.cmpi ne, %10, %c0_i32_9 : i32
    scf.if %11 {
      %c0_10 = arith.constant 0 : index
      %c0_11 = arith.constant 0 : index
      %12 = vector.load %arg6[%c0_10, %c0_11] : memref<256x128xf32, #tpu.memory_space<vmem>>, vector<256x128xf32>
      %c0_12 = arith.constant 0 : index
      %c0_13 = arith.constant 0 : index
      %13 = vector.load %arg4[%c0_12, %c0_13] : memref<1x128xf32, #tpu.memory_space<vmem>>, vector<1x128xf32>
      %14 = vector.broadcast %13 : vector<1x128xf32> to vector<256x128xf32>
      %15 = arith.addf %12, %14 : vector<256x128xf32>
      %c0_14 = arith.constant 0 : index
      %c0_15 = arith.constant 0 : index
      %16 = vector.load %arg5[%c0_14, %c0_15] : memref<256x128xf32, #tpu.memory_space<vmem>>, vector<256x128xf32>
      tpu.vector_store %arg5[%c0_14, %c0_15], %15 {strides = array<i32>} : memref<256x128xf32, #tpu.memory_space<vmem>>, vector<256x128xf32>,
    } else {
    }
    return
  }
  func.func @transform_0(%arg0: i32, %arg1: i32) -> (i32, i32) {
    %c0_i32 = arith.constant 0 : i32
    return %arg0, %arg1 : i32, i32
  }
  func.func @transform_1(%arg0: i32, %arg1: i32) -> (i32, i32) {
    %c0_i32 = arith.constant 0 : i32
    %c0_i32_0 = arith.constant 0 : i32
    return %arg1, %c0_i32 : i32, i32
  }
  func.func @transform_2(%arg0: i32, %arg1: i32) -> (i32, i32) {
    %c0_i32 = arith.constant 0 : i32
    %c0_i32_0 = arith.constant 0 : i32
    %c0_i32_1 = arith.constant 0 : i32
    return %c0_i32, %c0_i32_0 : i32, i32
  }
  func.func @transform_3(%arg0: i32, %arg1: i32) -> (i32, i32) {
    %c0_i32 = arith.constant 0 : i32
    %c0_i32_0 = arith.constant 0 : i32
    return %arg0, %c0_i32 : i32, i32
  }
}

</mosaic_0001>

<bundles_post_ra>
// kernel: quant_wrapper_conv2d.2
= control target key start
LH: loop header
LB: loop body
LE: loop exit
PB: predicated region body
PF: predicated region fallthrough
CT: control target
= control target key end

     0   :  { %7 = vsyncpa [#allocation3], 0  ;;  %s117_s0 = inlined_call_operand.vmem [shape: f32[3], index: 0, kind: input, shape index: {}]   ;;  %s118_s1 = inlined_call_operand.vmem [shape: f32[16,128], index: 1, kind: input, shape index: {}]   ;;  %s119_s2 = inlined_call_operand.vmem [shape: bf16[16,128], index: 2, kind: output, shape index: {}]  }
   0x1   :  { %s14_s11 = sshll.u32 %s117_s0, 4  ;;  %s15_s11 = int_to_ptr.vmem [resolvable:$true] %s14_s11 }
   0x2   :  { %s75_s12 = scalar_lea.vmem %s15_s11, 16  ;;  %p80_p1 = scmp.lt.s32.totalorder %s15_s11, %s15_s11 }
   0x3   :  { %p76_p0 = scmp.ne.s32.totalorder %s15_s11, %s75_s12  ;;  %p81_p2 = scmp.lt.s32.totalorder %s75_s12, %s75_s12 }
   0x5   :  { %p82_p3 = por %p81_p2, %p80_p1 }
   0x7   :  { %p83_p4 = pnand %p82_p3, %p76_p0 }
   0x9   :  { %86 = shalt.err (!%p83_p4)
}
   0xa   :  { %s89_s13 = smov [#allocation2]  }
   0xb   :  { %17 = dma.vmem_to_smem %s15_s11, 16, %s89_s13, [#allocation3]  }
   0xc   :  { %87 = dma.done.wait [#allocation3], 16  }
   0xd   :  { %88 = vsyncadd [#allocation3], 4294967280 }
   0xe   :  { %23 = sfence }
   0xf   :  { %s24_s14 = sld [smem:[#allocation2]]  ;;  %s62_s15 = sld [smem:[#allocation2 + $0x2]]  ;;  %v27_v0 = vld [vmem:[%s118_s1] sm:$0xff]  ;;  %v28_v1 = vld [vmem:[%s118_s1 + $0x8] sm:$0xff] }
  0x10   :  { %s61_s19 = sld [smem:[#allocation2 + $0x1]] }
  0x15   :  { %v29_v2 = vstv %s24_s14  ;;  %v32_v5 = vstv %s62_s15 }
  0x16   :  { %v30_v3 = vmul.f32 %v29_v2, %v27_v0  ;;  %v31_v4 = vmul.f32 %v29_v2, %v28_v1  ;;  %v43_v14 = vstv %s61_s19 }
  0x18   :  { %v33_v6 = vadd.f32 %v32_v5, %v30_v3  ;;  %v34_v7 = vadd.f32 %v32_v5, %v31_v4 }
  0x1a   :  { %v72_v8 = vround.rtne.f32 %v33_v6  ;;  %v73_v9 = vround.rtne.f32 %v34_v7 }
  0x1c   :  { %v37_v10 = vmax.f32 %v72_v8, 0.0  ;;  %v38_v11 = vmax.f32 %v73_v9, 0.0 }
  0x1e   :  { %v39_v12 = vmin.f32 %v37_v10, 255.0  ;;  %v40_v13 = vmin.f32 %v38_v11, 255.0 }
  0x20   :  { %v41_v15 = vsub.f32 %v39_v12, %v32_v5  ;;  %v42_v16 = vsub.f32 %v40_v13, %v32_v5 }
  0x22   :  { %v44_v17 = vmul.f32 %v43_v14, %v41_v15  ;;  %v45_v18 = vmul.f32 %v43_v14, %v42_v16 }
  0x24   :  { %v70_v19 = vpack.c.bf16 %v45_v18, %v44_v17 }
  0x26   :  { %71 = vst [vmem:[%s119_s2] sm:$0xff] %v70_v19  }
  0x27   :  { %60 = vsyncpa [#allocation3], 1 }

// kernel: quant_wrapper_conv2d.3
= control target key start
LH: loop header
LB: loop body
LE: loop exit
PB: predicated region body
PF: predicated region fallthrough
CT: control target
= control target key end

     0   :  { %s1111_s12 = smov 0   ;;  %s1113_s13 = smov 0   ;;  %s1261_s0 = inlined_call_operand.vmem [shape: bf16[512,128], index: 0, kind: input, shape index: {}]   ;;  %s1262_s1 = inlined_call_operand.vmem [shape: bf16[128,128], index: 1, kind: input, shape index: {}]   ;;  %s1263_s2 = inlined_call_operand.vmem [shape: f32[1,128], index: 2, kind: input, shape index: {}]   ;;  %s1264_s3 = inlined_call_operand.vmem [shape: f32[512,128], index: 3, kind: output, shape index: {}]  }
   0x1   :  { %s1115_s14 = smov 0  }
   0x2 LB: > { %s25_s15 = sadd.s32 1, %s1085_s13  ;;  %p899_p0 = scmp.ge.s32.totalorder %s1089_s14, 1  ;;  %s1089_s14 = sphi %s1115_s14, %s13_s14   ;;  %s1085_s13 = sphi %s1113_s13, %s1266_s13   ;;  %s1081_s12 = sphi %s1111_s12, %s1265_s12  }
   0x3   : > { %p27_p1 = scmp.ge.s32.totalorder %s25_s15, 2  ;;  %p166_p2 = scmp.lt.s32.totalorder %s1089_s14, 3 }
   0x5   : > { %s1268_s15 = smov (%p27_p1, %s25_s15), 0  ;;  %p167_p3 = pnand %p899_p0, %p166_p2 }
   0x6   : > { %v1043_v0 = vld [vmem:[%s1262_s1] sm:$0xff] (!%p167_p3)   ;;  %s900_s18 = sshll.u32 (!%p167_p3), %s1081_s12, 5  ;;  %v1044_v1 = vld [vmem:[%s1262_s1 + $0x8] sm:$0xff] (!%p167_p3)   ;;  %v1045_v2 = vld [vmem:[%s1262_s1 + $0x10] sm:$0xff] (!%p167_p3)  }
   0x7   : > { %170 = sbr.rel (%p167_p3) target bundleno = 281 (0x119), region = 32  ;;  %p199_p4 = scmp.lt.s32.totalorder (!%p167_p3), %s900_s18, 63  ;;  %955 = vmatprep.subr.bf16.mxu0 (!%p167_p3), %v1043_v0  ;;  %1003 = vmatprep.subr.bf16.mxu1 (!%p167_p3), %v1043_v0  ;;  %v1046_v3 = vld [vmem:[%s1262_s1 + $0x18] sm:$0xff] (!%p167_p3)   ;;  %v1047_v6 = vld [vmem:[%s1262_s1 + $0x20] sm:$0xff] (!%p167_p3)   ;;  %v1048_v7 = vld [vmem:[%s1262_s1 + $0x28] sm:$0xff] (!%p167_p3)  }
   0x8   : > { %956 = vmatpush3.bf16.msra.mxu0 (!%p167_p3), %v1043_v0  ;;  %1011 = vmatpush3.bf16.msra.mxu1 (!%p167_p3), %v1043_v0  ;;  %v1049_v8 = vld [vmem:[%s1262_s1 + $0x30] sm:$0xff] (!%p167_p3)   ;;  %v1050_v9 = vld [vmem:[%s1262_s1 + $0x38] sm:$0xff] (!%p167_p3)   ;;  %v1181_v24 = vld [vmem:[%s1263_s2] ss:$0 sm:$0xff] (!%p167_p3) }
   0x9   : > { %957 = vmatprep.subr.bf16.mxu0 (!%p167_p3), %v1044_v1  ;;  %1004 = vmatprep.subr.bf16.mxu1 (!%p167_p3), %v1044_v1 }
   0xc   : > { %958 = vmatpush3.bf16.msra.mxu0 (!%p167_p3), %v1044_v1  ;;  %1012 = vmatpush3.bf16.msra.mxu1 (!%p167_p3), %v1044_v1 }
   0xd   : > { %959 = vmatprep.subr.bf16.mxu0 (!%p167_p3), %v1045_v2  ;;  %1005 = vmatprep.subr.bf16.mxu1 (!%p167_p3), %v1045_v2 }
   0xe   : > { %s1270_s18 = smov (!%p199_p4, %s900_s18), 63 }
   0xf   : > { %s901_s23 = sshll.u32 %s1270_s18, 2  ;;  %s903_s10 = sshll.u32 %s1270_s18, 3 }
  0x10   : > { %s1144_s26 = scalar_lea.vmem %s1261_s0, %s901_s23  ;;  %960 = vmatpush3.bf16.msra.mxu0 %v1045_v2  ;;  %1013 = vmatpush3.bf16.msra.mxu1 %v1045_v2  ;;  %s1186_s19 = scalar_lea.vmem %s1264_s3, %s903_s10 }
  0x11   : > { %v1051_v4 = vld [vmem:[%s1144_s26] sm:$0xff]   ;;  %961 = vmatprep.subr.bf16.mxu0 %v1046_v3  ;;  %1006 = vmatprep.subr.bf16.mxu1 %v1046_v3  ;;  %v1053_v10 = vld [vmem:[%s1144_s26 + $0x8] sm:$0xff]   ;;  %v1055_v12 = vld [vmem:[%s1144_s26 + $0x10] sm:$0xff]  }
  0x12   : > { %v1052_v5 = vld [vmem:[%s1144_s26 + $0x40] sm:$0xff]   ;;  %971 = vmatprep.mubr.bf16.mxu0 %v1051_v4  ;;  %v1054_v11 = vld [vmem:[%s1144_s26 + $0x48] sm:$0xff]   ;;  %v1056_v13 = vld [vmem:[%s1144_s26 + $0x50] sm:$0xff]  }
  0x13   : > { %987 = vmatprep.mubr.bf16.mxu1 %v1052_v5  ;;  %v1057_v14 = vld [vmem:[%s1144_s26 + $0x18] sm:$0xff]   ;;  %v1059_v16 = vld [vmem:[%s1144_s26 + $0x20] sm:$0xff]   ;;  %v1061_v18 = vld [vmem:[%s1144_s26 + $0x28] sm:$0xff]  }
  0x14   : > { %962 = vmatpush3.bf16.msra.mxu0 %v1046_v3  ;;  %1014 = vmatpush3.bf16.msra.mxu1 %v1046_v3  ;;  %v1058_v15 = vld [vmem:[%s1144_s26 + $0x58] sm:$0xff]   ;;  %v1060_v17 = vld [vmem:[%s1144_s26 + $0x60] sm:$0xff]   ;;  %v1062_v19 = vld [vmem:[%s1144_s26 + $0x68] sm:$0xff]  }
  0x15   : > { %963 = vmatprep.subr.bf16.mxu0 %v1047_v6  ;;  %1007 = vmatprep.subr.bf16.mxu1 %v1047_v6  ;;  %v1063_v20 = vld [vmem:[%s1144_s26 + $0x30] sm:$0xff]   ;;  %v1065_v22 = vld [vmem:[%s1144_s26 + $0x38] sm:$0xff]  }
  0x16   : > { %v1064_v21 = vld [vmem:[%s1144_s26 + $0x70] sm:$0xff]   ;;  %v1066_v23 = vld [vmem:[%s1144_s26 + $0x78] sm:$0xff]  }
  0x18   : > { %964 = vmatpush3.bf16.msra.mxu0 %v1047_v6  ;;  %1015 = vmatpush3.bf16.msra.mxu1 %v1047_v6 }
  0x19   : > { %965 = vmatprep.subr.bf16.mxu0 %v1048_v7  ;;  %1008 = vmatprep.subr.bf16.mxu1 %v1048_v7 }
  0x1c   : > { %966 = vmatpush3.bf16.msra.mxu0 %v1048_v7  ;;  %1016 = vmatpush3.bf16.msra.mxu1 %v1048_v7 }
  0x1d   : > { %967 = vmatprep.subr.bf16.mxu0 %v1049_v8  ;;  %1009 = vmatprep.subr.bf16.mxu1 %v1049_v8 }
  0x20   : > { %968 = vmatpush3.bf16.msra.mxu0 %v1049_v8  ;;  %1017 = vmatpush3.bf16.msra.mxu1 %v1049_v8 }
  0x21   : > { %969 = vmatprep.subr.bf16.mxu0 %v1050_v9  ;;  %1010 = vmatprep.subr.bf16.mxu1 %v1050_v9 }
  0x24   : > { %970 = vmatpush3.bf16.msra.mxu0 %v1050_v9  ;;  %1018 = vmatpush3.bf16.msra.mxu1 %v1050_v9 }
  0x27   : > { %972 = vmatmul.mubr.bf16.vlgmr.msra.gmra.mrb[0].mxu0 %v1053_v10  ;;  %988 = vmatmul.mubr.bf16.vlgmr.msra.gmra.mrb[0].mxu1 %v1054_v11 }
  0x28   : > { %975 = vmatprep.mubr.bf16.mxu0 %v1055_v12  ;;  %991 = vmatprep.mubr.bf16.mxu1 %v1056_v13 }
  0x2f   : > { %976 = vmatmul.mubr.bf16.gmra.mrb[4].mxu0 %v1057_v14  ;;  %992 = vmatmul.mubr.bf16.gmra.mrb[4].mxu1 %v1058_v15 }
  0x30   : > { %979 = vmatprep.mubr.bf16.mxu0 %v1059_v16  ;;  %995 = vmatprep.mubr.bf16.mxu1 %v1060_v17 }
  0x37   : > { %980 = vmatmul.mubr.bf16.gmra.mrb[8].mxu0 %v1061_v18  ;;  %996 = vmatmul.mubr.bf16.gmra.mrb[8].mxu1 %v1062_v19 }
  0x38   : > { %983 = vmatprep.mubr.bf16.mxu0 %v1063_v20  ;;  %999 = vmatprep.mubr.bf16.mxu1 %v1064_v21 }
  0x3f   : > { %984 = vmatmul.mubr.bf16.gmra.mrb[12].mxu0 %v1065_v22  ;;  %1000 = vmatmul.mubr.bf16.gmra.mrb[12].mxu1 %v1066_v23 }
  0xfa   : > { %v973_v25 = vpop.f32.mrb[0].mxu0  ;;  %v989_v26 = vpop.f32.mrb[0].mxu1 }
  0xfb   : > { %v749_v27 = vadd.f32 %v973_v25, %v1181_v24  ;;  %v765_v28 = vadd.f32 %v989_v26, %v1181_v24  ;;  %v514_v29 = vpop.f32.mrb[1].mxu0  ;;  %v578_v30 = vpop.f32.mrb[1].mxu1 }
  0xfc   : > { %v747_v31 = vadd.f32 %v1181_v24, %v514_v29  ;;  %v763_v32 = vadd.f32 %v1181_v24, %v578_v30  ;;  %v974_v33 = vpop.f32.mrb[2].mxu0  ;;  %v990_v34 = vpop.f32.mrb[2].mxu1 }
  0xfd   : > { %781 = vst [vmem:[%s1186_s19 + $0x10] sm:$0xff] %v749_v27  ;;  %797 = vst [vmem:[%s1186_s19 + $0x90] sm:$0xff] %v765_v28  ;;  %v750_v35 = vadd.f32 %v974_v33, %v1181_v24  ;;  %v766_v36 = vadd.f32 %v990_v34, %v1181_v24  ;;  %v517_v37 = vpop.f32.mrb[3].mxu0  ;;  %v581_v38 = vpop.f32.mrb[3].mxu1 }
  0xfe   : > { %779 = vst [vmem:[%s1186_s19] sm:$0xff] %v747_v31  ;;  %795 = vst [vmem:[%s1186_s19 + $0x80] sm:$0xff] %v763_v32  ;;  %v748_v39 = vadd.f32 %v1181_v24, %v517_v37  ;;  %v764_v40 = vadd.f32 %v1181_v24, %v581_v38 }
  0xff   : > { %782 = vst [vmem:[%s1186_s19 + $0x18] sm:$0xff] %v750_v35  ;;  %798 = vst [vmem:[%s1186_s19 + $0x98] sm:$0xff] %v766_v36 }
 0x100   : > { %780 = vst [vmem:[%s1186_s19 + $0x8] sm:$0xff] %v748_v39  ;;  %796 = vst [vmem:[%s1186_s19 + $0x88] sm:$0xff] %v764_v40 }
 0x102   : > { %v977_v41 = vpop.f32.mrb[4].mxu0  ;;  %v993_v42 = vpop.f32.mrb[4].mxu1 }
 0x103   : > { %v753_v43 = vadd.f32 %v977_v41, %v1181_v24  ;;  %v769_v44 = vadd.f32 %v993_v42, %v1181_v24  ;;  %v530_v45 = vpop.f32.mrb[5].mxu0  ;;  %v594_v46 = vpop.f32.mrb[5].mxu1 }
 0x104   : > { %v751_v47 = vadd.f32 %v1181_v24, %v530_v45  ;;  %v767_v48 = vadd.f32 %v1181_v24, %v594_v46  ;;  %v978_v49 = vpop.f32.mrb[6].mxu0  ;;  %v994_v50 = vpop.f32.mrb[6].mxu1 }
 0x105   : > { %785 = vst [vmem:[%s1186_s19 + $0x30] sm:$0xff] %v753_v43  ;;  %801 = vst [vmem:[%s1186_s19 + $0xb0] sm:$0xff] %v769_v44  ;;  %v754_v51 = vadd.f32 %v978_v49, %v1181_v24  ;;  %v770_v52 = vadd.f32 %v994_v50, %v1181_v24  ;;  %v533_v53 = vpop.f32.mrb[7].mxu0  ;;  %v597_v54 = vpop.f32.mrb[7].mxu1 }
 0x106   : > { %783 = vst [vmem:[%s1186_s19 + $0x20] sm:$0xff] %v751_v47  ;;  %799 = vst [vmem:[%s1186_s19 + $0xa0] sm:$0xff] %v767_v48  ;;  %v752_v55 = vadd.f32 %v1181_v24, %v533_v53  ;;  %v768_v56 = vadd.f32 %v1181_v24, %v597_v54 }
 0x107   : > { %786 = vst [vmem:[%s1186_s19 + $0x38] sm:$0xff] %v754_v51  ;;  %802 = vst [vmem:[%s1186_s19 + $0xb8] sm:$0xff] %v770_v52 }
 0x108   : > { %784 = vst [vmem:[%s1186_s19 + $0x28] sm:$0xff] %v752_v55  ;;  %800 = vst [vmem:[%s1186_s19 + $0xa8] sm:$0xff] %v768_v56 }
 0x10a   : > { %v981_v57 = vpop.f32.mrb[8].mxu0  ;;  %v997_v58 = vpop.f32.mrb[8].mxu1 }
 0x10b   : > { %v757_v59 = vadd.f32 %v981_v57, %v1181_v24  ;;  %v773_v60 = vadd.f32 %v997_v58, %v1181_v24  ;;  %v546_v61 = vpop.f32.mrb[9].mxu0  ;;  %v610_v62 = vpop.f32.mrb[9].mxu1 }
 0x10c   : > { %v755_v63 = vadd.f32 %v1181_v24, %v546_v61  ;;  %v771_v0 = vadd.f32 %v1181_v24, %v610_v62  ;;  %v982_v1 = vpop.f32.mrb[10].mxu0  ;;  %v998_v2 = vpop.f32.mrb[10].mxu1 }
 0x10d   : > { %789 = vst [vmem:[%s1186_s19 + $0x50] sm:$0xff] %v757_v59  ;;  %805 = vst [vmem:[%s1186_s19 + $0xd0] sm:$0xff] %v773_v60  ;;  %v758_v3 = vadd.f32 %v982_v1, %v1181_v24  ;;  %v774_v4 = vadd.f32 %v998_v2, %v1181_v24  ;;  %v549_v5 = vpop.f32.mrb[11].mxu0  ;;  %v613_v6 = vpop.f32.mrb[11].mxu1 }
 0x10e   : > { %787 = vst [vmem:[%s1186_s19 + $0x40] sm:$0xff] %v755_v63  ;;  %803 = vst [vmem:[%s1186_s19 + $0xc0] sm:$0xff] %v771_v0  ;;  %v756_v7 = vadd.f32 %v1181_v24, %v549_v5  ;;  %v772_v8 = vadd.f32 %v1181_v24, %v613_v6 }
 0x10f   : > { %790 = vst [vmem:[%s1186_s19 + $0x58] sm:$0xff] %v758_v3  ;;  %806 = vst [vmem:[%s1186_s19 + $0xd8] sm:$0xff] %v774_v4 }
 0x110   : > { %788 = vst [vmem:[%s1186_s19 + $0x48] sm:$0xff] %v756_v7  ;;  %804 = vst [vmem:[%s1186_s19 + $0xc8] sm:$0xff] %v772_v8 }
 0x112   : > { %v985_v9 = vpop.f32.mrb[12].mxu0  ;;  %v1001_v10 = vpop.f32.mrb[12].mxu1 }
 0x113   : > { %v761_v11 = vadd.f32 %v985_v9, %v1181_v24  ;;  %v777_v12 = vadd.f32 %v1001_v10, %v1181_v24  ;;  %v562_v13 = vpop.f32.mrb[13].mxu0  ;;  %v626_v14 = vpop.f32.mrb[13].mxu1 }
 0x114   : > { %v759_v15 = vadd.f32 %v1181_v24, %v562_v13  ;;  %v775_v16 = vadd.f32 %v1181_v24, %v626_v14  ;;  %v986_v17 = vpop.f32.mrb[14].mxu0  ;;  %v1002_v18 = vpop.f32.mrb[14].mxu1 }
 0x115   : > { %793 = vst [vmem:[%s1186_s19 + $0x70] sm:$0xff] %v761_v11  ;;  %809 = vst [vmem:[%s1186_s19 + $0xf0] sm:$0xff] %v777_v12  ;;  %v762_v19 = vadd.f32 %v986_v17, %v1181_v24  ;;  %v778_v20 = vadd.f32 %v1002_v18, %v1181_v24  ;;  %v565_v21 = vpop.f32.mrb[15].mxu0  ;;  %v629_v22 = vpop.f32.mrb[15].mxu1 }
 0x116   : > { %791 = vst [vmem:[%s1186_s19 + $0x60] sm:$0xff] %v759_v15  ;;  %807 = vst [vmem:[%s1186_s19 + $0xe0] sm:$0xff] %v775_v16  ;;  %v760_v23 = vadd.f32 %v1181_v24, %v565_v21  ;;  %v776_v25 = vadd.f32 %v1181_v24, %v629_v22 }
 0x117   : > { %794 = vst [vmem:[%s1186_s19 + $0x78] sm:$0xff] %v762_v19  ;;  %810 = vst [vmem:[%s1186_s19 + $0xf8] sm:$0xff] %v778_v20 }
 0x118   : > { %792 = vst [vmem:[%s1186_s19 + $0x68] sm:$0xff] %v760_v23  ;;  %808 = vst [vmem:[%s1186_s19 + $0xe8] sm:$0xff] %v776_v25 }
 0x119 PF: > { %s13_s14 = sadd.s32 1, %s1089_s14   ;;  %s1265_s12 = smov %s1085_s13 }
 0x11a   : > { %p10_p5 = scmp.ge.s32.totalorder %s13_s14, 4   ;;  %s1266_s13 = smov %s1268_s15 }
 0x11c   :  { %12 = sbr.rel (!%p10_p5) target bundleno = 2 (0x2), region = 73 }

</bundles_post_ra>
